<compile_context>
chip_gen: v5e
topology: v5e:2x2
jax: 0.10.0
libtpu: 0.0.40
codegen_flags: <defaults>
</compile_context>

<pallas_src>
import functools

import jax
import jax.numpy as jnp
from jax.experimental import pallas as pl
from jax.experimental.pallas import tpu as pltpu

PAIRWISE_EPS = 1e-6          # torch.nn.functional.pairwise_distance default eps
_LANES = 128
_NBUF = 2                    # double buffering assumed for BlockSpec pipelining
_TMP_F32_TILES = 8           # conservative count of block-sized f32 temporaries
_MAX_VMEM_LIMIT = 96 * 1024 * 1024


def _hi_lo(x):
    """Split an f32 array into a bf16-exact 'hi' part and an f32 'lo' remainder."""
    hi = x.astype(jnp.bfloat16).astype(jnp.float32)
    return hi, x - hi


def _contrastive_loss_kernel(out1_ref, out2_ref, label_ref, partial_ref, *,
                             margin, rows_valid, tile_rows, fold, feat):
    i = pl.program_id(0)

    o1 = out1_ref[...].astype(jnp.float32)           # (T, fold*feat)
    o2 = out2_ref[...].astype(jnp.float32)
    lbl = label_ref[...]                              # (fold, T) f32, 0/1, 0 in padding

    # F.pairwise_distance adds eps to the elementwise difference before the norm.
    diff = (o1 - o2) + PAIRWISE_EPS
    sq = diff * diff                                  # (T, fold*feat)

    if fold == 1:
        # One original row per block row -> plain lane reduce.
        sq_dist = jnp.sum(sq, axis=-1, keepdims=True)                    # (T, 1)
    else:
        # Folded layout: block row t holds `fold` original rows of `feat` features.
        # Segmented lane reduce via the (idle) MXU with a 0/1 segment matrix.
        dm = fold * feat
        lane = jax.lax.broadcasted_iota(jnp.int32, (dm, fold), 0)
        grp = jax.lax.broadcasted_iota(jnp.int32, (dm, fold), 1)
        seg = ((lane >= grp * feat) & (lane < (grp + 1) * feat)).astype(jnp.float32)
        sq_hi, sq_lo = _hi_lo(sq)                     # precision-robust f32 matmul
        sq_dist = (jnp.dot(sq_hi, seg, preferred_element_type=jnp.float32)
                   + jnp.dot(sq_lo, seg, preferred_element_type=jnp.float32))  # (T, fold)

    dist = jnp.sqrt(sq_dist)
    hinge = jnp.maximum(margin - dist, 0.0)
    # loss_row = (1 - l) * dist^2 + l * hinge^2 = dist^2 + l * (hinge^2 - dist^2)
    m = hinge * hinge - sq_dist                       # (T, fold)

    # Mask rows past the true batch (unpadded inputs -> ragged last tile contents
    # are unspecified and must never reach the sums).
    row_id = i * tile_rows + jax.lax.broadcasted_iota(jnp.int32, sq_dist.shape, 0)
    valid = row_id < rows_valid
    sq_dist = jnp.where(valid, sq_dist, 0.0)
    m = jnp.where(valid, m, 0.0)

    # Label-weighted term: sum_{t,f} lbl[f,t] * m[t,f] == trace(lbl @ m).
    m_hi, m_lo = _hi_lo(m)
    p = (jnp.dot(lbl, m_hi, preferred_element_type=jnp.float32)
         + jnp.dot(lbl, m_lo, preferred_element_type=jnp.float32))       # (fold, fold)
    fi = jax.lax.broadcasted_iota(jnp.int32, p.shape, 0)
    fj = jax.lax.broadcasted_iota(jnp.int32, p.shape, 1)
    label_term = jnp.sum(jnp.where(fi == fj, p, 0.0))

    partial = jnp.sum(sq_dist) + label_term
    # Per-tile partial sum written as a lane-dense (8, 128) block (unmasked stores).
    partial_ref[...] = jnp.broadcast_to(partial, (8, 128))


def _vmem_budget_bytes():
    cap = 0
    try:
        cap = int(getattr(pltpu.get_tpu_info(), "vmem_capacity_bytes", 0) or 0)
    except Exception:
        cap = 0
    if cap <= 0:
        cap = 64 * 1024 * 1024          # conservative fallback: smallest VMEM (v7x)
    return int(min(cap * 3 // 4, _MAX_VMEM_LIMIT))


def contrastive_loss(out1, out2, label, margin=1.0, tile_rows=None):
    """Pallas TPU implementation of ContrastiveLoss.forward.

    out1, out2: (B, D) float arrays
    label:      (B,)   array (0 = similar pair, 1 = dissimilar pair)
    returns:    scalar float32 loss
    """
    B, D = out1.shape
    itemsize = jnp.dtype(out1.dtype).itemsize

    # --- small-feature folding: (B, D) -> (B//fold, fold*D), free bitcast ---------
    fold = 1
    if D < _LANES and _LANES % D == 0 and B % (_LANES // D) == 0:
        fold = _LANES // D
    R = B // fold                         # rows after folding
    Dm = D * fold                         # features per folded row
    if fold > 1:
        out1 = out1.reshape(R, Dm)
        out2 = out2.reshape(R, Dm)

    # --- generation-aware tile sizing against real VMEM bytes ---------------------
    # TODO(synk): no feature-dim tiling; a single 128-row block of a very large D
    # must fit in VMEM.
    vmem_limit = _vmem_budget_bytes()
    lane_dm = ((Dm + _LANES - 1) // _LANES) * _LANES        # lane-padded feature width
    f_pad = max(8, fold)                                     # sublane-padded label rows
    bytes_per_row = (2 * _NBUF * lane_dm * itemsize          # two data inputs, 2 buffers
                     + _TMP_F32_TILES * lane_dm * 4          # f32 elementwise temporaries
                     + _NBUF * f_pad * 4)                    # lane-dense label block
    r_ceil = pl.cdiv(R, _LANES) * _LANES

    if tile_rows is None:
        tile_rows = max(_LANES,
                        (int(vmem_limit * 0.85) // bytes_per_row) // _LANES * _LANES)
    else:
        tile_rows = max(_LANES, (int(tile_rows) // _LANES) * _LANES)
    # Use >= 2 grid steps whenever the batch allows it (shards the "parallel" axis
    # across v7x's two TensorCores / DMA paths; negligible cost on v5e/v6e).
    if r_ceil >= 2 * _LANES:
        tile_rows = min(tile_rows, max(_LANES, (r_ceil // 2) // _LANES * _LANES))
    tile_rows = min(tile_rows, r_ceil)
    if tile_rows >= R:                   # single tile: exact row count, no OOB rows
        tile_rows = R
    num_tiles = pl.cdiv(R, tile_rows)
    total_cols = num_tiles * tile_rows

    # --- lane-dense label layout: lab[f, r] = label[r*fold + f] -------------------
    lab = label.reshape(-1).astype(jnp.float32)
    lab = lab.reshape(R, fold).T                              # (fold, R), tiny transpose
    lab = jnp.pad(lab, ((0, 0), (0, total_cols - R)))         # zero ragged columns only

    kernel = functools.partial(
        _contrastive_loss_kernel,
        margin=float(margin), rows_valid=R, tile_rows=tile_rows,
        fold=fold, feat=D,
    )

    partials = pl.pallas_call(
        kernel,
        out_shape=jax.ShapeDtypeStruct((8, num_tiles * _LANES), jnp.float32),
        grid=(num_tiles,),
        in_specs=[
            pl.BlockSpec((tile_rows, Dm), lambda i: (i, 0)),
            pl.BlockSpec((tile_rows, Dm), lambda i: (i, 0)),
            pl.BlockSpec((fold, tile_rows), lambda i: (0, i)),
        ],
        out_specs=pl.BlockSpec((8, _LANES), lambda i: (0, i)),
        compiler_params=pltpu.CompilerParams(
            dimension_semantics=("parallel",),   # no carried state across tiles
            vmem_limit_bytes=vmem_limit,
        ),
    )(out1, out2, lab)

    # Lane 0 of each tile's (8, 128) block holds that tile's partial sum.
    return jnp.sum(partials[0, ::128]) / B


def _reference(out1, out2, label, margin=1.0):
    # Pure-JAX reference mirroring the PyTorch module.
    diff = out1.astype(jnp.float32) - out2.astype(jnp.float32) + PAIRWISE_EPS
    dist = jnp.sqrt(jnp.sum(diff * diff, axis=-1))
    loss = (1.0 - label) * dist ** 2 + label * jnp.maximum(margin - dist, 0.0) ** 2
    return jnp.mean(loss)


if __name__ == "__main__":
    key = jax.random.PRNGKey(0)

    def _check(B, D, margin=1.0):
        k1, k2, k3 = jax.random.split(jax.random.fold_in(key, B * 1000 + D), 3)
        o1 = jax.random.normal(k1, (B, D), dtype=jnp.float32)
        o2 = jax.random.normal(k2, (B, D), dtype=jnp.float32)
        lbl = jax.random.bernoulli(k3, p=0.5, shape=(B,)).astype(jnp.float32)
        got = contrastive_loss(o1, o2, lbl, margin=margin)
        jax.block_until_ready(got)
        want = _reference(o1, o2, lbl, margin=margin)
        assert jnp.allclose(got, want, rtol=1e-4, atol=1e-6), (B, D, got, want)

    # Small siamese-embedding batch (folded path, single tile).
    _check(B=20, D=32)
    # Folded path with several grid steps and a ragged (masked) last tile.
    _check(B=1048, D=32)
    # Unfolded path (D does not divide 128) with several grid steps + ragged tile.
    _check(B=300, D=48)

    print("KERNEL_OK")
</pallas_src>

<mosaic_0001>
module attributes {stable_mosaic.version = 11 : i64} {
  func.func @_contrastive_loss_kernel(%arg0: i32, %arg1: memref<5x128xf32, #tpu.memory_space<vmem>>, %arg2: memref<5x128xf32, #tpu.memory_space<vmem>>, %arg3: memref<4x5xf32, #tpu.memory_space<vmem>>, %arg4: memref<8x128xf32, #tpu.memory_space<vmem>>) attributes {dimension_semantics = [#tpu.dimension_semantics<parallel>], iteration_bounds = array<i64: 1>, scalar_prefetch = 0 : i64, scratch_operands = 0 : i64, tpu.core_type = #tpu.core_type<tc>, window_params = [{transform_indices = @transform_0, window_bounds = array<i64: 5, 128>}, {transform_indices = @transform_1, window_bounds = array<i64: 5, 128>}, {transform_indices = @transform_2, window_bounds = array<i64: 4, 5>}, {transform_indices = @transform_3, window_bounds = array<i64: 8, 128>}]} {
    %c0 = arith.constant 0 : index
    %c0_0 = arith.constant 0 : index
    %0 = vector.load %arg1[%c0, %c0_0] : memref<5x128xf32, #tpu.memory_space<vmem>>, vector<5x128xf32>
    %c0_1 = arith.constant 0 : index
    %c0_2 = arith.constant 0 : index
    %1 = vector.load %arg2[%c0_1, %c0_2] : memref<5x128xf32, #tpu.memory_space<vmem>>, vector<5x128xf32>
    %c0_3 = arith.constant 0 : index
    %c0_4 = arith.constant 0 : index
    %2 = vector.load %arg3[%c0_3, %c0_4] : memref<4x5xf32, #tpu.memory_space<vmem>>, vector<4x5xf32>
    %3 = arith.subf %0, %1 : vector<5x128xf32>
    %cst = arith.constant 9.99999997E-7 : f32
    %4 = vector.broadcast %cst : f32 to vector<5x128xf32>
    %5 = arith.addf %3, %4 : vector<5x128xf32>
    %6 = arith.mulf %5, %5 : vector<5x128xf32>
    %7 = tpu.iota {dimensions = array<i32: 0>} : vector<128x4xi32>
    %8 = tpu.iota {dimensions = array<i32: 1>} : vector<128x4xi32>
    %c32_i32 = arith.constant 32 : i32
    %9 = vector.broadcast %c32_i32 : i32 to vector<128x4xi32>
    %10 = arith.muli %8, %9 : vector<128x4xi32>
    %11 = arith.cmpi sge, %7, %10 : vector<128x4xi32>
    %c1_i32 = arith.constant 1 : i32
    %12 = vector.broadcast %c1_i32 : i32 to vector<128x4xi32>
    %13 = arith.addi %8, %12 : vector<128x4xi32>
    %c32_i32_5 = arith.constant 32 : i32
    %14 = vector.broadcast %c32_i32_5 : i32 to vector<128x4xi32>
    %15 = arith.muli %13, %14 : vector<128x4xi32>
    %16 = arith.cmpi slt, %7, %15 : vector<128x4xi32>
    %17 = arith.andi %11, %16 : vector<128x4xi1>
    %18 = arith.extui %17 : vector<128x4xi1> to vector<128x4xi32>
    %19 = arith.sitofp %18 : vector<128x4xi32> to vector<128x4xf32>
    %20 = arith.truncf %6 : vector<5x128xf32> to vector<5x128xbf16>
    %21 = arith.extf %20 : vector<5x128xbf16> to vector<5x128xf32>
    %22 = arith.subf %6, %21 : vector<5x128xf32>
    %cst_6 = arith.constant dense<0.000000e+00> : vector<5x4xf32>
    %23 = tpu.matmul %21, %19, %cst_6 {dimension_numbers = #tpu.dot_dimension_numbers<[1], [0], [0], [1], [0, 0, 1, 1], [], []>} : vector<5x128xf32>, vector<128x4xf32>, vector<5x4xf32> -> vector<5x4xf32>
    %cst_7 = arith.constant dense<0.000000e+00> : vector<5x4xf32>
    %24 = tpu.matmul %22, %19, %cst_7 {dimension_numbers = #tpu.dot_dimension_numbers<[1], [0], [0], [1], [0, 0, 1, 1], [], []>} : vector<5x128xf32>, vector<128x4xf32>, vector<5x4xf32> -> vector<5x4xf32>
    %25 = arith.addf %23, %24 : vector<5x4xf32>
    %26 = math.sqrt %25 : vector<5x4xf32>
    %cst_8 = arith.constant 1.000000e+00 : f32
    %27 = vector.broadcast %cst_8 : f32 to vector<5x4xf32>
    %28 = arith.subf %27, %26 : vector<5x4xf32>
    %cst_9 = arith.constant 0.000000e+00 : f32
    %29 = vector.broadcast %cst_9 : f32 to vector<5x4xf32>
    %30 = arith.maximumf %28, %29 : vector<5x4xf32>
    %31 = arith.mulf %30, %30 : vector<5x4xf32>
    %32 = arith.subf %31, %25 : vector<5x4xf32>
    %c5_i32 = arith.constant 5 : i32
    %33 = arith.muli %arg0, %c5_i32 : i32
    %34 = tpu.iota {dimensions = array<i32: 0>} : vector<5x4xi32>
    %35 = vector.broadcast %33 : i32 to vector<5x4xi32>
    %36 = arith.addi %35, %34 : vector<5x4xi32>
    %c5_i32_10 = arith.constant 5 : i32
    %37 = vector.broadcast %c5_i32_10 : i32 to vector<5x4xi32>
    %38 = arith.cmpi slt, %36, %37 : vector<5x4xi32>
    %cst_11 = arith.constant 0.000000e+00 : f32
    %39 = vector.broadcast %cst_11 : f32 to vector<5x4xf32>
    %40 = arith.select %38, %25, %39 : vector<5x4xi1>, vector<5x4xf32>
    %cst_12 = arith.constant 0.000000e+00 : f32
    %41 = vector.broadcast %cst_12 : f32 to vector<5x4xf32>
    %42 = arith.select %38, %32, %41 : vector<5x4xi1>, vector<5x4xf32>
    %43 = arith.truncf %42 : vector<5x4xf32> to vector<5x4xbf16>
    %44 = arith.extf %43 : vector<5x4xbf16> to vector<5x4xf32>
    %45 = arith.subf %42, %44 : vector<5x4xf32>
    %cst_13 = arith.constant dense<0.000000e+00> : vector<4x4xf32>
    %46 = tpu.matmul %2, %44, %cst_13 {dimension_numbers = #tpu.dot_dimension_numbers<[1], [0], [0], [1], [0, 0, 1, 1], [], []>} : vector<4x5xf32>, vector<5x4xf32>, vector<4x4xf32> -> vector<4x4xf32>
    %cst_14 = arith.constant dense<0.000000e+00> : vector<4x4xf32>
    %47 = tpu.matmul %2, %45, %cst_14 {dimension_numbers = #tpu.dot_dimension_numbers<[1], [0], [0], [1], [0, 0, 1, 1], [], []>} : vector<4x5xf32>, vector<5x4xf32>, vector<4x4xf32> -> vector<4x4xf32>
    %48 = arith.addf %46, %47 : vector<4x4xf32>
    %49 = tpu.iota {dimensions = array<i32: 0>} : vector<4x4xi32>
    %50 = tpu.iota {dimensions = array<i32: 1>} : vector<4x4xi32>
    %51 = arith.cmpi eq, %49, %50 : vector<4x4xi32>
    %cst_15 = arith.constant 0.000000e+00 : f32
    %52 = vector.broadcast %cst_15 : f32 to vector<4x4xf32>
    %53 = arith.select %51, %48, %52 : vector<4x4xi1>, vector<4x4xf32>
    %54 = vector.shape_cast %53 : vector<4x4xf32> to vector<1x4x4xf32>
    %cst_16 = arith.constant dense<0.000000e+00> : vector<1xf32>
    %55 = vector.multi_reduction <add>, %54, %cst_16 [1, 2] : vector<1x4x4xf32> to vector<1xf32>
    %56 = vector.shape_cast %55 : vector<1xf32> to vector<1x1x1xf32>
    %57 = vector.extract %56[0, 0, 0] : f32 from vector<1x1x1xf32>
    %58 = vector.shape_cast %40 : vector<5x4xf32> to vector<1x5x4xf32>
    %cst_17 = arith.constant dense<0.000000e+00> : vector<1xf32>
    %59 = vector.multi_reduction <add>, %58, %cst_17 [1, 2] : vector<1x5x4xf32> to vector<1xf32>
    %60 = vector.shape_cast %59 : vector<1xf32> to vector<1x1x1xf32>
    %61 = vector.extract %60[0, 0, 0] : f32 from vector<1x1x1xf32>
    %62 = arith.addf %61, %57 : f32
    %63 = vector.broadcast %62 : f32 to vector<8x128xf32>
    %c0_18 = arith.constant 0 : index
    %c0_19 = arith.constant 0 : index
    %64 = vector.load %arg4[%c0_18, %c0_19] : memref<8x128xf32, #tpu.memory_space<vmem>>, vector<8x128xf32>
    tpu.vector_store %arg4[%c0_18, %c0_19], %63 {strides = array<i32>} : memref<8x128xf32, #tpu.memory_space<vmem>>, vector<8x128xf32>,
    return
  }
  func.func @transform_0(%arg0: i32) -> (i32, i32) {
    %c0_i32 = arith.constant 0 : i32
    %c0_i32_0 = arith.constant 0 : i32
    return %arg0, %c0_i32 : i32, i32
  }
  func.func @transform_1(%arg0: i32) -> (i32, i32) {
    %c0_i32 = arith.constant 0 : i32
    %c0_i32_0 = arith.constant 0 : i32
    return %arg0, %c0_i32 : i32, i32
  }
  func.func @transform_2(%arg0: i32) -> (i32, i32) {
    %c0_i32 = arith.constant 0 : i32
    %c0_i32_0 = arith.constant 0 : i32
    return %c0_i32, %arg0 : i32, i32
  }
  func.func @transform_3(%arg0: i32) -> (i32, i32) {
    %c0_i32 = arith.constant 0 : i32
    %c0_i32_0 = arith.constant 0 : i32
    return %c0_i32, %arg0 : i32, i32
  }
}

</mosaic_0001>

<bundles_post_ra>
// kernel: tpu_custom_call.1
= control target key start
LH: loop header
LB: loop body
LE: loop exit
PB: predicated region body
PF: predicated region fallthrough
CT: control target
= control target key end

     0   :  { %8 = vsyncpa [#allocation3], 0  ;;  %s628_s0 = inlined_call_operand.hbm [shape: f32[5,128], index: 0, kind: input, shape index: {}]   ;;  %s629_s1 = inlined_call_operand.hbm [shape: f32[5,128], index: 1, kind: input, shape index: {}]   ;;  %s630_s2 = inlined_call_operand.hbm [shape: f32[4,5], index: 2, kind: input, shape index: {}]   ;;  %s631_s3 = inlined_call_operand.hbm [shape: f32[8,128], index: 3, kind: output, shape index: {}]  }
   0x1   :  { %9 = vsyncpa [#allocation6], 0  ;;  %s27_s14 = sshll.u32 %s629_s1, 4  ;;  %s28_s14 = int_to_ptr.hbm [resolvable:$true] %s27_s14 }
   0x2   :  { %10 = vsyncpa [#allocation4], 0  ;;  %s493_s15 = smov [#allocation5]   ;;  %s16_s19 = sshll.u32 %s628_s0, 4  ;;  %s17_s19 = int_to_ptr.hbm [resolvable:$true] %s16_s19 }
   0x3   :  { %s29_s16 = sshll.u32 %s493_s15, 4  ;;  %s494_s20 = smov [#allocation2]   ;;  %s30_s16 = int_to_ptr.vmem [resolvable:$true] %s29_s16 }
   0x4   :  { %32 = dma.hbm_to_vmem [thread:$0]  %s28_s14, 128, %s30_s16, [#allocation6]  }
   0x5   :  { %s18_s21 = sshll.u32 %s494_s20, 4  ;;  %s38_s24 = sshll.u32 %s630_s2, 4  ;;  %s19_s21 = int_to_ptr.vmem [resolvable:$true] %s18_s21  ;;  %s39_s24 = int_to_ptr.hbm [resolvable:$true] %s38_s24 }
   0x6   :  { %21 = dma.hbm_to_vmem [thread:$0]  %s17_s19, 128, %s19_s21, [#allocation3]  }
   0x7   :  { %s495_s1 = smov [#allocation7]  }
   0x8   :  { %s40_s25 = sshll.u32 %s495_s1, 4  ;;  %s41_s25 = int_to_ptr.vmem [resolvable:$true] %s40_s25 }
   0x9   :  { %43 = dma.hbm_to_vmem [thread:$0]  %s39_s24, 64, %s41_s25, [#allocation6]  }
   0xa   :  { %487 = dma.done.wait [#allocation3], 128  }
   0xb   :  { %488 = vsyncadd [#allocation3], 4294967168  ;;  %v62_v0 = vlaneseq }
   0xc   :  { %489 = dma.done.wait [#allocation6], 192  }
   0xd   :  { %490 = vsyncadd [#allocation6], 4294967104  ;;  %v527_v1 = vshrl.u32 %v62_v0, 7  ;;  %v529_v2 = vand.u32 127, %v62_v0  ;;  %v496_v11 = vmov 1.0   ;;  %s497_s0 = smov [#allocation8]  }
   0xe   :  { %v56_v15 = vld [vmem:[#allocation2] sm:$0x1f]  ;;  %v57_v16 = vld [vmem:[#allocation5] sm:$0x1f]  ;;  %v58_v51 = vld [vmem:[#allocation7] sm:$0xf] }
   0xf   :  { %v78_v3 = vadd.s32 120, %v527_v1  ;;  %v533_v4 = vmul.u32 32, %v529_v2  ;;  %v98_v5 = vadd.s32 1, %v529_v2  ;;  %v77_v6 = vadd.s32 112, %v527_v1  ;;  %s315_s2 = sshll.u32 %s497_s0, 4  ;;  %s317_s29 = sshll.u32 %s631_s3, 4  ;;  %s316_s2 = int_to_ptr.vmem [resolvable:$true] %s315_s2  ;;  %s318_s29 = int_to_ptr.hbm [resolvable:$true] %s317_s29 }
  0x10   :  { %v76_v7 = vadd.s32 104, %v527_v1  ;;  %v75_v9 = vadd.s32 96, %v527_v1  ;;  %v74_v10 = vadd.s32 88, %v527_v1  ;;  %v73_v12 = vadd.s32 80, %v527_v1 }
  0x11   :  { %vm97_vm0 = vcmp.ge.s32.totalorder %v78_v3, %v533_v4  ;;  %v539_v8 = vmul.u32 32, %v98_v5  ;;  %vm96_vm1 = vcmp.ge.s32.totalorder %v77_v6, %v533_v4  ;;  %v72_v13 = vadd.s32 72, %v527_v1 }
  0x12   :  { %vm95_vm4 = vcmp.ge.s32.totalorder %v76_v7, %v533_v4  ;;  %vm94_vm8 = vcmp.ge.s32.totalorder %v75_v9, %v533_v4  ;;  %vm93_vm11 = vcmp.ge.s32.totalorder %v74_v10, %v533_v4  ;;  %vm92_vm14 = vcmp.ge.s32.totalorder %v73_v12, %v533_v4 }
  0x13   :  { %vm115_vm2 = vcmp.lt.s32.totalorder %v78_v3, %v539_v8  ;;  %vm114_vm3 = vcmp.lt.s32.totalorder %v77_v6, %v539_v8  ;;  %vm113_vm5 = vcmp.lt.s32.totalorder %v76_v7, %v539_v8  ;;  %vm112_vm9 = vcmp.lt.s32.totalorder %v75_v9, %v539_v8 }
  0x14   :  { %vm131_vm6 = vmand %vm97_vm0, %vm115_vm2  ;;  %vm111_vm12 = vcmp.lt.s32.totalorder %v74_v10, %v539_v8  ;;  %vm110_vm15 = vcmp.lt.s32.totalorder %v73_v12, %v539_v8  ;;  %v71_v14 = vadd.s32 64, %v527_v1  ;;  %vm109_vm2 = vcmp.lt.s32.totalorder %v72_v13, %v539_v8 }
  0x15   :  { %344 = vmatpush.msk.msra.mxu0 %vm131_vm6, %v496_v11  ;;  %360 = vmatpush.msk.msra.mxu1 %vm131_vm6, %v496_v11  ;;  %vm130_vm7 = vmand %vm96_vm1, %vm114_vm3  ;;  %vm91_vm1 = vcmp.ge.s32.totalorder %v72_v13, %v533_v4  ;;  %v70_v17 = vadd.s32 56, %v527_v1  ;;  %v59_v18 = vsub.f32 %v56_v15, %v57_v16  ;;  %v69_v19 = vadd.s32 48, %v527_v1 }
  0x16   :  { %vm129_vm10 = vmand %vm95_vm4, %vm113_vm5  ;;  %vm90_vm4 = vcmp.ge.s32.totalorder %v71_v14, %v533_v4  ;;  %vm108_vm5 = vcmp.lt.s32.totalorder %v71_v14, %v539_v8  ;;  %v68_v20 = vadd.s32 40, %v527_v1  ;;  %v67_v22 = vadd.s32 32, %v527_v1 }
  0x17   :  { %345 = vmatpush.msk.msra.mxu0 %vm130_vm7, %v496_v11  ;;  %361 = vmatpush.msk.msra.mxu1 %vm130_vm7, %v496_v11  ;;  %vm128_vm13 = vmand %vm94_vm8, %vm112_vm9  ;;  %vm89_vm7 = vcmp.ge.s32.totalorder %v70_v17, %v533_v4  ;;  %vm107_vm8 = vcmp.lt.s32.totalorder %v70_v17, %v539_v8  ;;  %v60_v21 = vadd.f32 1e-06, %v59_v18  ;;  %v66_v23 = vadd.s32 24, %v527_v1 }
  0x18   :  { %vm127_vm0 = vmand %vm93_vm11, %vm111_vm12  ;;  %vm106_vm11 = vcmp.lt.s32.totalorder %v69_v19, %v539_v8  ;;  %v65_v25 = vadd.s32 16, %v527_v1  ;;  %v64_v26 = vadd.s32 8, %v527_v1 }
  0x19   :  { %346 = vmatpush.msk.msra.mxu0 %vm129_vm10, %v496_v11  ;;  %362 = vmatpush.msk.msra.mxu1 %vm129_vm10, %v496_v11  ;;  %vm126_vm3 = vmand %vm92_vm14, %vm110_vm15  ;;  %vm88_vm10 = vcmp.ge.s32.totalorder %v69_v19, %v533_v4  ;;  %vm105_vm14 = vcmp.lt.s32.totalorder %v68_v20, %v539_v8  ;;  %v61_v24 = vmul.f32 %v60_v21, %v60_v21 }
  0x1a   :  { %vm125_vm6 = vmand %vm91_vm1, %vm109_vm2  ;;  %vm104_vm1 = vcmp.lt.s32.totalorder %v67_v22, %v539_v8 }
  0x1b   :  { %347 = vmatpush.msk.msra.mxu0 %vm128_vm13, %v496_v11  ;;  %363 = vmatpush.msk.msra.mxu1 %vm128_vm13, %v496_v11  ;;  %vm124_vm9 = vmand %vm90_vm4, %vm108_vm5  ;;  %vm87_vm13 = vcmp.ge.s32.totalorder %v68_v20, %v533_v4  ;;  %vm103_vm4 = vcmp.lt.s32.totalorder %v66_v23, %v539_v8  ;;  %v164_v27 = vpack.c.bf16 %v61_v24, %v61_v24 }
  0x1c   :  { %vm123_vm12 = vmand %vm89_vm7, %vm107_vm8  ;;  %vm102_vm7 = vcmp.lt.s32.totalorder %v65_v25, %v539_v8 }
  0x1d   :  { %348 = vmatpush.msk.msra.mxu0 %vm127_vm0, %v496_v11  ;;  %364 = vmatpush.msk.msra.mxu1 %vm127_vm0, %v496_v11  ;;  %vm122_vm15 = vmand %vm88_vm10, %vm106_vm11  ;;  %vm86_vm0 = vcmp.ge.s32.totalorder %v67_v22, %v533_v4  ;;  %vm101_vm10 = vcmp.lt.s32.totalorder %v64_v26, %v539_v8  ;;  %v165_v28 = vunpack.c.l.bf16 %v164_v27 }
  0x1e   :  { %vm121_vm2 = vmand %vm87_vm13, %vm105_vm14  ;;  %vm100_vm13 = vcmp.lt.s32.totalorder %v527_v1, %v539_v8 }
  0x1f   :  { %349 = vmatpush.msk.msra.mxu0 %vm126_vm3, %v496_v11  ;;  %365 = vmatpush.msk.msra.mxu1 %vm126_vm3, %v496_v11  ;;  %vm85_vm3 = vcmp.ge.s32.totalorder %v66_v23, %v533_v4  ;;  %vm120_vm5 = vmand %vm86_vm0, %vm104_vm1  ;;  %v166_v29 = vsub.f32 %v61_v24, %v165_v28  ;;  %vm226_vm0 = vcmp.lt.s32.totalorder %v527_v1, 5 }
  0x20   :  { %vm119_vm8 = vmand %vm85_vm3, %vm103_vm4  ;;  %vm236_vm3 = vcmask 1044480   ;;  %vm232_vm4 = vcmask 39936  }
  0x21   :  { %350 = vmatpush.msk.msra.mxu0 %vm125_vm6, %v496_v11  ;;  %366 = vmatpush.msk.msra.mxu1 %vm125_vm6, %v496_v11  ;;  %vm84_vm6 = vcmp.ge.s32.totalorder %v65_v25, %v533_v4 }
  0x22   :  { %vm118_vm11 = vmand %vm84_vm6, %vm102_vm7  ;;  %vm285_vm6 = vcmask 27648   ;;  %vm296_vm7 = vcmask 28672  }
  0x23   :  { %351 = vmatpush.msk.msra.mxu0 %vm124_vm9, %v496_v11  ;;  %367 = vmatpush.msk.msra.mxu1 %vm124_vm9, %v496_v11  ;;  %vm83_vm9 = vcmp.ge.s32.totalorder %v64_v26, %v533_v4 }
  0x24   :  { %vm117_vm14 = vmand %vm83_vm9, %vm101_vm10 }
  0x25   :  { %352 = vmatpush.msk.msra.mxu0 %vm123_vm12, %v496_v11  ;;  %368 = vmatpush.msk.msra.mxu1 %vm123_vm12, %v496_v11  ;;  %vm82_vm12 = vcmp.ge.s32.totalorder %v527_v1, %v533_v4 }
  0x27   :  { %353 = vmatpush.msk.msra.mxu0 %vm122_vm15, %v496_v11  ;;  %369 = vmatpush.msk.msra.mxu1 %vm122_vm15, %v496_v11  ;;  %vm116_vm15 = vmand %vm82_vm12, %vm100_vm13 }
  0x29   :  { %354 = vmatpush.msk.msra.mxu0 %vm121_vm2, %v496_v11  ;;  %370 = vmatpush.msk.msra.mxu1 %vm121_vm2, %v496_v11 }
  0x2b   :  { %355 = vmatpush.msk.msra.mxu0 %vm120_vm5, %v496_v11  ;;  %371 = vmatpush.msk.msra.mxu1 %vm120_vm5, %v496_v11  ;;  %vm283_vm5 = vcmp.eq.s32.totalorder %v527_v1, %v529_v2 }
  0x2d   :  { %356 = vmatpush.msk.msra.mxu0 %vm119_vm8, %v496_v11  ;;  %372 = vmatpush.msk.msra.mxu1 %vm119_vm8, %v496_v11 }
  0x2f   :  { %357 = vmatpush.msk.msra.mxu0 %vm118_vm11, %v496_v11  ;;  %373 = vmatpush.msk.msra.mxu1 %vm118_vm11, %v496_v11 }
  0x31   :  { %358 = vmatpush.msk.msra.mxu0 %vm117_vm14, %v496_v11  ;;  %374 = vmatpush.msk.msra.mxu1 %vm117_vm14, %v496_v11 }
  0x33   :  { %359 = vmatpush.msk.msra.mxu0 %vm116_vm15, %v496_v11  ;;  %375 = vmatpush.msk.msra.mxu1 %vm116_vm15, %v496_v11 }
  0x34   :  { %183 = vmatmul.f32.vlgmr.msra.gmra.mxu0 %v166_v29  ;;  %203 = vmatmul.f32.vlgmr.msra.gmra.mxu1 %v165_v28 }
  0xb1   :  { %v184_v30 = vpop.f32.mrf.mxu0  ;;  %v204_v31 = vpop.f32.mrf.mxu1 }
  0xb2   :  { %v205_v32 = vadd.f32 %v204_v31, %v184_v30 }
  0xb4   :  { %389 = vrsqrt.f32 %v205_v32  ;;  %v227_v33 = vsel %vm226_vm0, %v205_v32, 0.0  ;;  %vm214_vm1 = vcmp.eq.f32.partialorder %v205_v32, inf  ;;  %v217_v41 = vand.u32 2147483648, %v205_v32 }
  0xb5   :  { %vm216_vm2 = vcmp.eq.f32.partialorder %v205_v32, 0.0  ;;  %v297_v58 = vsel %vm296_vm7, %v227_v33, 0.0 }
  0xba   :  { %v390_v34 = vpop.eup %389 }
  0xbb   :  { %v208_v35 = vmul.f32 %v390_v34, %v205_v32 }
  0xbd   :  { %v209_v36 = vmul.f32 %v390_v34, %v208_v35 }
  0xbf   :  { %v210_v37 = vmul.f32 0.5, %v209_v36 }
  0xc1   :  { %v211_v38 = vsub.f32 1.5, %v210_v37 }
  0xc3   :  { %v212_v39 = vmul.f32 %v390_v34, %v211_v38 }
  0xc5   :  { %v213_v40 = vmul.f32 %v212_v39, %v205_v32 }
  0xc7   :  { %v215_v42 = vsel %vm214_vm1, %v205_v32, %v213_v40 }
  0xc8   :  { %v218_v43 = vsel %vm216_vm2, %v217_v41, %v215_v42 }
  0xc9   :  { %v219_v44 = vsub.f32 1.0, %v218_v43 }
  0xcb   :  { %v220_v45 = vmax.f32 %v219_v44, 0.0 }
  0xcd   :  { %v221_v46 = vmul.f32 %v220_v45, %v220_v45 }
  0xcf   :  { %v222_v47 = vsub.f32 %v221_v46, %v205_v32 }
  0xd1   :  { %v228_v48 = vsel %vm226_vm0, %v222_v47, 0.0 }
  0xd2   :  { %v229_v49 = vpack.c.bf16 %v228_v48, %v228_v48 }
  0xd4   :  { %v230_v50 = vunpack.c.l.bf16 %v229_v49 }
  0xd6   :  { %378 = vmatpush.msk.msra.mxu3 %vm236_vm3, %v230_v50  ;;  %v231_v52 = vsub.f32 %v228_v48, %v230_v50 }
  0xd7   :  { %379 = vmatmul.msk.f32.vlgmr.msra.gmra.mxu3 %vm232_vm4, %v58_v51 }
  0xd8   :  { %376 = vmatpush.msk.msra.mxu2 %vm236_vm3, %v231_v52 }
  0xd9   :  { %377 = vmatmul.msk.f32.vlgmr.msra.gmra.mxu2 %vm232_vm4, %v58_v51 }
 0x15a   :  { %v280_v53 = vpop.f32.mrf.mxu3 }
 0x15c   :  { %v257_v54 = vpop.f32.mrf.mxu2 }
 0x15d   :  { %v281_v55 = vadd.f32 %v280_v53, %v257_v54 }
 0x15f   :  { %v284_v56 = vsel %vm283_vm5, %v281_v55, 0.0 }
 0x160   :  { %v286_v57 = vsel %vm285_vm6, %v284_v56, 0.0 }
 0x161   :  { %287 = vadd.xlane.f32.xlu0 %v286_v57 }
 0x169   :  { %298 = vadd.xlane.f32.xlu0 %v297_v58 }
 0x1d4   :  { %v288_v59 = vpop.xlane.xlu0 %287 }
 0x1d5   :  { %v289_v60 = vrot.slane %v288_v59, 4 }
 0x1d7   :  { %v290_v61 = vadd.f32 %v289_v60, %v288_v59 }
 0x1d9   :  { %v291_v62 = vrot.slane %v290_v61, 2 }
 0x1db   :  { %v292_v63 = vadd.f32 %v291_v62, %v290_v61 }
 0x1dc   :  { %v299_v0 = vpop.xlane.xlu0 %298 }
 0x1dd   :  { %v300_v3 = vrot.slane %v299_v0, 4  ;;  %v293_v4 = vrot.slane %v292_v63, 1 }
 0x1df   :  { %v301_v5 = vadd.f32 %v300_v3, %v299_v0  ;;  %v294_v6 = vadd.f32 %v293_v4, %v292_v63 }
 0x1e1   :  { %v302_v7 = vrot.slane %v301_v5, 2  ;;  %380 = vpush %v294_v6 }
 0x1e3   :  { %v303_v1 = vadd.f32 %v302_v7, %v301_v5 }
 0x1e5   :  { %v304_v2 = vrot.slane %v303_v1, 1 }
 0x1e7   :  { %v305_v8 = vadd.f32 %v304_v2, %v303_v1 }
 0x1e9   :  { %382 = vpush %v305_v8 }
 0x212   :  { %s381_s26 = spop %380 }
 0x21a   :  { %s383_s30 = spop %382 }
 0x21b   :  { %s307_s4 = sadd.f32 %s383_s30, %s381_s26 }
 0x21d   :  { %v308_v9 = vstv %s307_s4 }
 0x21e   :  { %309 = vst [vmem:[#allocation8] sm:$0xff] %v308_v9 }
 0x21f   :  { %320 = dma.vmem_to_hbm [thread:$0]  %s316_s2, 128, %s318_s29, [#allocation4]  }
 0x220   :  { %491 = dma.done.wait [#allocation4], 128  }
 0x221   :  { %492 = vsyncadd [#allocation4], 4294967168 }
 0x222   :  { %325 = vsyncpa [#allocation3], 1 }
 0x223   :  { %326 = vsyncpa [#allocation6], 1 }
 0x224   :  { %327 = vsyncpa [#allocation4], 1 }

</bundles_post_ra>
